<compile_context>
chip_gen: v5e
topology: v5e:2x2
jax: 0.10.0
libtpu: 0.0.40
codegen_flags: <defaults>
</compile_context>

<pallas_src>
import functools
import math

import jax
import jax.numpy as jnp
from jax.experimental import pallas as pl
from jax.experimental.pallas import tpu as pltpu

EPS = 1e-5


def _round_up(x, m):
    return ((x + m - 1) // m) * m


def _vmem_limit_bytes():
    # Generation-aware scoped-VMEM budget: ~80% of physical, capped.
    try:
        info = pltpu.get_tpu_info()
        cap = getattr(info, "vmem_capacity_bytes", None)
        if cap:
            return min(int(cap * 0.8), 112 * 1024 * 1024)
    except Exception:
        pass
    return 48 * 1024 * 1024  # safe fallback (fits v7x's 64 MiB)


def _layernorm(x, scale, shift):
    # One-pass layernorm: var = E[x^2] - mean^2 (biased, matches PyTorch).
    mean = jnp.mean(x, axis=-1, keepdims=True)
    msq = jnp.mean(x * x, axis=-1, keepdims=True)
    var = msq - mean * mean
    return (x - mean) * jax.lax.rsqrt(var + EPS) * scale + shift


def _gelu(x):
    # tanh-approximation GELU (GPT-2 style).
    c = math.sqrt(2.0 / math.pi)
    return 0.5 * x * (1.0 + jnp.tanh(c * (x + 0.044715 * x * x * x)))


def transformer_stack_kernel(x_ref, ln1_s_ref, ln1_b_ref, wqkv_ref, bqkv_ref,
                             wo_ref, bo_ref, ln2_s_ref, ln2_b_ref,
                             w1_ref, b1_ref, w2_ref, b2_ref,
                             lnf_s_ref, lnf_b_ref,
                             out_ref, mask_ref, *, n_heads):
    layer = pl.program_id(1)
    T, D = out_ref.shape[1], out_ref.shape[2]
    H = n_heads
    Dh = D // H

    # First layer of each batch element: load the input activation into the
    # resident output block and build the causal additive bias once.
    @pl.when(layer == 0)
    def _():
        out_ref[0] = x_ref[0]
        qi = jax.lax.broadcasted_iota(jnp.int32, (T, T), 0)
        ki = jax.lax.broadcasted_iota(jnp.int32, (T, T), 1)
        mask_ref[...] = jnp.where(ki > qi, -1e30, 0.0).astype(jnp.float32)

    x = out_ref[0]                                   # (T, D) f32, resident across layers
    mask = mask_ref[...]                             # (T, T) additive causal bias

    # ----- attention sublayer (pre-norm) -----
    h = _layernorm(x, ln1_s_ref[0], ln1_b_ref[0]).astype(jnp.bfloat16)
    # Single full-width QKV projection: (T, D) x (D, 3D).  1/sqrt(Dh) is
    # already folded into the Q columns of Wqkv (and its bias) at init.
    qkv = jnp.dot(h, wqkv_ref[0],
                  preferred_element_type=jnp.float32) + bqkv_ref[0]   # (T, 3D)

    ctx_heads = []
    for head in range(H):                            # static unroll over heads
        lo = head * Dh
        q_h = qkv[:, lo:lo + Dh].astype(jnp.bfloat16)                 # (T, Dh)
        k_h = qkv[:, D + lo:D + lo + Dh].astype(jnp.bfloat16)         # (T, Dh)
        v_h = qkv[:, 2 * D + lo:2 * D + lo + Dh].astype(jnp.bfloat16)  # (T, Dh)

        s = jax.lax.dot_general(                     # q @ k^T -> (T, T)
            q_h, k_h, dimension_numbers=(((1,), (1,)), ((), ())),
            preferred_element_type=jnp.float32)
        s = s + mask
        m = jnp.max(s, axis=-1, keepdims=True)
        p = jnp.exp(s - m)
        denom = jnp.sum(p, axis=-1, keepdims=True)
        p = (p * pl.reciprocal(denom, approx=True)).astype(jnp.bfloat16)
        ctx_heads.append(jnp.dot(p, v_h, preferred_element_type=jnp.float32))

    ctx = jnp.concatenate(ctx_heads, axis=-1).astype(jnp.bfloat16)    # (T, D)
    attn = jnp.dot(ctx, wo_ref[0],
                   preferred_element_type=jnp.float32) + bo_ref[0]    # (T, D)
    x = x + attn                                     # dropout == identity at eval

    # ----- feed-forward sublayer (pre-norm) -----
    h2 = _layernorm(x, ln2_s_ref[0], ln2_b_ref[0]).astype(jnp.bfloat16)
    h2 = jnp.dot(h2, w1_ref[0],
                 preferred_element_type=jnp.float32) + b1_ref[0]      # (T, Dff)
    h2 = _gelu(h2)
    h2 = jnp.dot(h2.astype(jnp.bfloat16), w2_ref[0],
                 preferred_element_type=jnp.float32) + b2_ref[0]      # (T, D)
    y = x + h2                                       # dropout == identity at eval
    out_ref[0] = y

    # Tail: apply the final LayerNorm once, on the last layer, so the LM head
    # kernel does not redo it for every vocab tile.
    @pl.when(layer == pl.num_programs(1) - 1)
    def _():
        out_ref[0] = _layernorm(y, lnf_s_ref[...], lnf_b_ref[...])


def lm_head_kernel(x_ref, wh_ref, out_ref):
    out_ref[0] = jnp.dot(x_ref[0].astype(jnp.bfloat16), wh_ref[...],
                         preferred_element_type=jnp.float32).astype(out_ref.dtype)


def apply_blocks(x, p, n_heads):
    B, T, D = x.shape
    L = p['wqkv'].shape[0]
    H = n_heads
    assert D % H == 0
    Dff = p['w1'].shape[2]
    vmem_limit = _vmem_limit_bytes()

    in_specs = [
        pl.BlockSpec((1, T, D), lambda b, l: (b, 0, 0)),          # x (fetched once per b)
        pl.BlockSpec((1, 1, D), lambda b, l: (l, 0, 0)),          # ln1 scale
        pl.BlockSpec((1, 1, D), lambda b, l: (l, 0, 0)),          # ln1 shift
        pl.BlockSpec((1, D, 3 * D), lambda b, l: (l, 0, 0)),      # Wqkv (flat, full-width)
        pl.BlockSpec((1, 1, 3 * D), lambda b, l: (l, 0, 0)),      # bqkv
        pl.BlockSpec((1, D, D), lambda b, l: (l, 0, 0)),          # Wo (flat)
        pl.BlockSpec((1, 1, D), lambda b, l: (l, 0, 0)),          # bo
        pl.BlockSpec((1, 1, D), lambda b, l: (l, 0, 0)),          # ln2 scale
        pl.BlockSpec((1, 1, D), lambda b, l: (l, 0, 0)),          # ln2 shift
        pl.BlockSpec((1, D, Dff), lambda b, l: (l, 0, 0)),        # W1
        pl.BlockSpec((1, 1, Dff), lambda b, l: (l, 0, 0)),        # b1
        pl.BlockSpec((1, Dff, D), lambda b, l: (l, 0, 0)),        # W2
        pl.BlockSpec((1, 1, D), lambda b, l: (l, 0, 0)),          # b2
        pl.BlockSpec((1, D), lambda b, l: (0, 0)),                # final LN scale
        pl.BlockSpec((1, D), lambda b, l: (0, 0)),                # final LN shift
    ]
    return pl.pallas_call(
        functools.partial(transformer_stack_kernel, n_heads=H),
        out_shape=jax.ShapeDtypeStruct((B, T, D), jnp.float32),
        grid=(B, L),
        in_specs=in_specs,
        out_specs=pl.BlockSpec((1, T, D), lambda b, l: (b, 0, 0)),
        scratch_shapes=[pltpu.VMEM((T, T), jnp.float32)],         # causal bias
        compiler_params=pltpu.CompilerParams(
            dimension_semantics=("parallel", "arbitrary"),
            vmem_limit_bytes=vmem_limit),
    )(x, p['ln1_s'], p['ln1_b'], p['wqkv'], p['bqkv'], p['wo'], p['bo'],
      p['ln2_s'], p['ln2_b'], p['w1'], p['b1'], p['w2'], p['b2'],
      p['lnf_s'], p['lnf_b'])


def apply_final(x, wh):
    # LM head: x already final-layernormed by the stack kernel.
    B, T, D = x.shape
    V = wh.shape[1]
    vmem_limit = _vmem_limit_bytes()
    # Lane-dense vocab tiles; pad the vocab so arbitrary V (e.g. 50257) never
    # creates a whole-vocab block.  Padded logits are sliced off afterwards.
    tv = 2048 if V >= 2048 else _round_up(V, 128)
    v_pad = _round_up(V, tv)
    if v_pad != V:
        wh = jnp.pad(wh, ((0, 0), (0, v_pad - V)))

    logits = pl.pallas_call(
        lm_head_kernel,
        out_shape=jax.ShapeDtypeStruct((B, T, v_pad), jnp.bfloat16),  # bf16 store: halves HBM writeback
        grid=(B, v_pad // tv),
        in_specs=[pl.BlockSpec((1, T, D), lambda b, v: (b, 0, 0)),
                  pl.BlockSpec((D, tv), lambda b, v: (0, v))],
        out_specs=pl.BlockSpec((1, T, tv), lambda b, v: (b, 0, v)),
        compiler_params=pltpu.CompilerParams(
            dimension_semantics=("parallel", "parallel"),
            vmem_limit_bytes=vmem_limit),
    )(x, wh)
    return logits[..., :V] if v_pad != V else logits


def init_params(key, cfg):
    V, C, D = cfg['vocab_size'], cfg['context_length'], cfg['embed_dim']
    L, H = cfg['n_layers'], cfg['n_heads']
    Dh = D // H
    Dff = 4 * D
    keys = jax.random.split(key, 7)

    def normal(k, shape, scale=0.02):
        return (scale * jax.random.normal(k, shape, dtype=jnp.float32))

    # Fold 1/sqrt(Dh) into the Q columns of Wqkv (and its bias) so the kernel
    # never does an explicit Q-scaling VPU pass.
    qkv_scale = jnp.concatenate([
        jnp.full((D,), 1.0 / math.sqrt(Dh), jnp.float32),
        jnp.ones((2 * D,), jnp.float32)])

    params = {
        'tok_emb': normal(keys[0], (V, D)),
        'pos_emb': normal(keys[1], (C, D)),
        'lnf_s': jnp.ones((1, D), jnp.float32),
        'lnf_b': jnp.zeros((1, D), jnp.float32),
        'head_w': normal(keys[2], (D, V)).astype(jnp.bfloat16),
        # Per-layer block weights stacked along a leading L axis; matmul
        # weights bf16 and stored flat so every projection is one full-width
        # MXU matmul.
        'ln1_s': jnp.ones((L, 1, D), jnp.float32),
        'ln1_b': jnp.zeros((L, 1, D), jnp.float32),
        'wqkv': (normal(keys[3], (L, D, 3 * D)) * qkv_scale).astype(jnp.bfloat16),
        'bqkv': jnp.zeros((L, 1, 3 * D), jnp.float32) * qkv_scale,   # qkv_bias=True
        'wo': normal(keys[4], (L, D, D)).astype(jnp.bfloat16),
        'bo': jnp.zeros((L, 1, D), jnp.float32),
        'ln2_s': jnp.ones((L, 1, D), jnp.float32),
        'ln2_b': jnp.zeros((L, 1, D), jnp.float32),
        'w1': normal(keys[5], (L, D, Dff)).astype(jnp.bfloat16),
        'b1': jnp.zeros((L, 1, Dff), jnp.float32),
        'w2': normal(keys[6], (L, Dff, D)).astype(jnp.bfloat16),
        'b2': jnp.zeros((L, 1, D), jnp.float32),
    }
    return params


def gpt_forward(idx, params, cfg):
    B, T = idx.shape
    # Embedding gathers are plain-JAX glue (no matmul hot path).
    x = params['tok_emb'][idx] + params['pos_emb'][:T][None, :, :]
    # TODO(synk): dropout is identity here (eval mode); train-mode dropout not implemented.
    x = apply_blocks(x, params, cfg['n_heads'])          # includes final LayerNorm
    logits = apply_final(x, params['head_w'])
    return logits


if __name__ == "__main__":
    cfg = dict(vocab_size=128, context_length=16, embed_dim=32,
               n_layers=2, n_heads=4, drop_rate=0.1, qkv_bias=True)

    key = jax.random.PRNGKey(0)
    k_param, k_idx = jax.random.split(key)
    params = init_params(k_param, cfg)

    batch, seq_len = 2, 8
    idx = jax.random.randint(k_idx, (batch, seq_len), 0, cfg['vocab_size'],
                             dtype=jnp.int32)

    logits = gpt_forward(idx, params, cfg)
    logits = jax.block_until_ready(logits)
    assert logits.shape == (batch, seq_len, cfg['vocab_size'])
    assert bool(jnp.all(jnp.isfinite(logits.astype(jnp.float32))))
    print("KERNEL_OK")
</pallas_src>

<mosaic_0001>
module attributes {stable_mosaic.version = 11 : i64} {
  func.func @transformer_stack_kernel(%arg0: i32, %arg1: i32, %arg2: memref<1x8x32xf32, #tpu.memory_space<vmem>>, %arg3: memref<1x1x32xf32, #tpu.memory_space<vmem>>, %arg4: memref<1x1x32xf32, #tpu.memory_space<vmem>>, %arg5: memref<1x32x96xbf16, #tpu.memory_space<vmem>>, %arg6: memref<1x1x96xf32, #tpu.memory_space<vmem>>, %arg7: memref<1x32x32xbf16, #tpu.memory_space<vmem>>, %arg8: memref<1x1x32xf32, #tpu.memory_space<vmem>>, %arg9: memref<1x1x32xf32, #tpu.memory_space<vmem>>, %arg10: memref<1x1x32xf32, #tpu.memory_space<vmem>>, %arg11: memref<1x32x128xbf16, #tpu.memory_space<vmem>>, %arg12: memref<1x1x128xf32, #tpu.memory_space<vmem>>, %arg13: memref<1x128x32xbf16, #tpu.memory_space<vmem>>, %arg14: memref<1x1x32xf32, #tpu.memory_space<vmem>>, %arg15: memref<1x32xf32, #tpu.memory_space<vmem>>, %arg16: memref<1x32xf32, #tpu.memory_space<vmem>>, %arg17: memref<1x8x32xf32, #tpu.memory_space<vmem>>, %arg18: memref<8x8xf32, #tpu.memory_space<vmem>>) attributes {dimension_semantics = [#tpu.dimension_semantics<parallel>, #tpu.dimension_semantics<arbitrary>], iteration_bounds = array<i64: 2, 2>, scalar_prefetch = 0 : i64, scratch_operands = 1 : i64, tpu.core_type = #tpu.core_type<tc>, window_params = [{transform_indices = @transform_0, window_bounds = array<i64: 1, 8, 32>}, {transform_indices = @transform_1, window_bounds = array<i64: 1, 1, 32>}, {transform_indices = @transform_2, window_bounds = array<i64: 1, 1, 32>}, {transform_indices = @transform_3, window_bounds = array<i64: 1, 32, 96>}, {transform_indices = @transform_4, window_bounds = array<i64: 1, 1, 96>}, {transform_indices = @transform_5, window_bounds = array<i64: 1, 32, 32>}, {transform_indices = @transform_6, window_bounds = array<i64: 1, 1, 32>}, {transform_indices = @transform_7, window_bounds = array<i64: 1, 1, 32>}, {transform_indices = @transform_8, window_bounds = array<i64: 1, 1, 32>}, {transform_indices = @transform_9, window_bounds = array<i64: 1, 32, 128>}, {transform_indices = @transform_10, window_bounds = array<i64: 1, 1, 128>}, {transform_indices = @transform_11, window_bounds = array<i64: 1, 128, 32>}, {transform_indices = @transform_12, window_bounds = array<i64: 1, 1, 32>}, {pipeline_mode = #tpu.pipeline_mode<synchronous>, transform_indices = @transform_13, window_bounds = array<i64: 1, 32>}, {pipeline_mode = #tpu.pipeline_mode<synchronous>, transform_indices = @transform_14, window_bounds = array<i64: 1, 32>}, {transform_indices = @transform_15, window_bounds = array<i64: 1, 8, 32>}]} {
    %c0_i32 = arith.constant 0 : i32
    %0 = arith.cmpi eq, %arg1, %c0_i32 : i32
    %1 = arith.extui %0 : i1 to i32
    %c0_i32_0 = arith.constant 0 : i32
    %2 = arith.cmpi ne, %1, %c0_i32_0 : i32
    scf.if %2 {
      %c0_78 = arith.constant 0 : index
      %c0_79 = arith.constant 0 : index
      %c0_80 = arith.constant 0 : index
      %192 = vector.load %arg2[%c0_78, %c0_79, %c0_80] : memref<1x8x32xf32, #tpu.memory_space<vmem>>, vector<1x8x32xf32>
      %193 = vector.shape_cast %192 : vector<1x8x32xf32> to vector<8x32xf32>
      %c0_81 = arith.constant 0 : index
      %c0_82 = arith.constant 0 : index
      %c0_83 = arith.constant 0 : index
      %194 = vector.load %arg17[%c0_81, %c0_82, %c0_83] : memref<1x8x32xf32, #tpu.memory_space<vmem>>, vector<1x8x32xf32>
      %195 = vector.shape_cast %194 : vector<1x8x32xf32> to vector<8x32xf32>
      %196 = vector.shape_cast %193 : vector<8x32xf32> to vector<1x8x32xf32>
      tpu.vector_store %arg17[%c0_81, %c0_82, %c0_83], %196 {strides = array<i32>} : memref<1x8x32xf32, #tpu.memory_space<vmem>>, vector<1x8x32xf32>,
      %197 = tpu.iota {dimensions = array<i32: 0>} : vector<8x8xi32>
      %198 = tpu.iota {dimensions = array<i32: 1>} : vector<8x8xi32>
      %199 = arith.cmpi sgt, %198, %197 : vector<8x8xi32>
      %cst_84 = arith.constant -1.000000e+30 : f32
      %cst_85 = arith.constant 0.000000e+00 : f32
      %200 = vector.broadcast %cst_84 : f32 to vector<8x8xf32>
      %201 = vector.broadcast %cst_85 : f32 to vector<8x8xf32>
      %202 = arith.select %199, %200, %201 : vector<8x8xi1>, vector<8x8xf32>
      %c0_86 = arith.constant 0 : index
      %c0_87 = arith.constant 0 : index
      %203 = vector.load %arg18[%c0_86, %c0_87] : memref<8x8xf32, #tpu.memory_space<vmem>>, vector<8x8xf32>
      tpu.vector_store %arg18[%c0_86, %c0_87], %202 {strides = array<i32>} : memref<8x8xf32, #tpu.memory_space<vmem>>, vector<8x8xf32>,
    } else {
    }
    %c0 = arith.constant 0 : index
    %c0_1 = arith.constant 0 : index
    %c0_2 = arith.constant 0 : index
    %3 = vector.load %arg17[%c0, %c0_1, %c0_2] : memref<1x8x32xf32, #tpu.memory_space<vmem>>, vector<1x8x32xf32>
    %4 = vector.shape_cast %3 : vector<1x8x32xf32> to vector<8x32xf32>
    %c0_3 = arith.constant 0 : index
    %c0_4 = arith.constant 0 : index
    %5 = vector.load %arg18[%c0_3, %c0_4] : memref<8x8xf32, #tpu.memory_space<vmem>>, vector<8x8xf32>
    %c0_5 = arith.constant 0 : index
    %c0_6 = arith.constant 0 : index
    %c0_7 = arith.constant 0 : index
    %6 = vector.load %arg3[%c0_5, %c0_6, %c0_7] : memref<1x1x32xf32, #tpu.memory_space<vmem>>, vector<1x1x32xf32>
    %7 = vector.shape_cast %6 : vector<1x1x32xf32> to vector<1x32xf32>
    %c0_8 = arith.constant 0 : index
    %c0_9 = arith.constant 0 : index
    %c0_10 = arith.constant 0 : index
    %8 = vector.load %arg4[%c0_8, %c0_9, %c0_10] : memref<1x1x32xf32, #tpu.memory_space<vmem>>, vector<1x1x32xf32>
    %9 = vector.shape_cast %8 : vector<1x1x32xf32> to vector<1x32xf32>
    %cst = arith.constant dense<0.000000e+00> : vector<8xf32>
    %10 = vector.multi_reduction <add>, %4, %cst [1] : vector<8x32xf32> to vector<8xf32>
    %11 = vector.shape_cast %10 : vector<8xf32> to vector<8x1xf32>
    %cst_11 = arith.constant 3.200000e+01 : f32
    %12 = vector.broadcast %cst_11 : f32 to vector<8x1xf32>
    %13 = arith.divf %11, %12 : vector<8x1xf32>
    %14 = arith.mulf %4, %4 : vector<8x32xf32>
    %cst_12 = arith.constant dense<0.000000e+00> : vector<8xf32>
    %15 = vector.multi_reduction <add>, %14, %cst_12 [1] : vector<8x32xf32> to vector<8xf32>
    %16 = vector.shape_cast %15 : vector<8xf32> to vector<8x1xf32>
    %cst_13 = arith.constant 3.200000e+01 : f32
    %17 = vector.broadcast %cst_13 : f32 to vector<8x1xf32>
    %18 = arith.divf %16, %17 : vector<8x1xf32>
    %19 = arith.mulf %13, %13 : vector<8x1xf32>
    %20 = arith.subf %18, %19 : vector<8x1xf32>
    %21 = vector.broadcast %13 : vector<8x1xf32> to vector<8x32xf32>
    %22 = arith.subf %4, %21 : vector<8x32xf32>
    %cst_14 = arith.constant 9.99999974E-6 : f32
    %23 = vector.broadcast %cst_14 : f32 to vector<8x1xf32>
    %24 = arith.addf %20, %23 : vector<8x1xf32>
    %25 = math.rsqrt %24 : vector<8x1xf32>
    %26 = vector.broadcast %25 : vector<8x1xf32> to vector<8x32xf32>
    %27 = arith.mulf %22, %26 : vector<8x32xf32>
    %28 = vector.broadcast %7 : vector<1x32xf32> to vector<8x32xf32>
    %29 = arith.mulf %27, %28 : vector<8x32xf32>
    %30 = vector.broadcast %9 : vector<1x32xf32> to vector<8x32xf32>
    %31 = arith.addf %29, %30 : vector<8x32xf32>
    %32 = arith.truncf %31 : vector<8x32xf32> to vector<8x32xbf16>
    %c0_15 = arith.constant 0 : index
    %c0_16 = arith.constant 0 : index
    %c0_17 = arith.constant 0 : index
    %33 = vector.load %arg5[%c0_15, %c0_16, %c0_17] : memref<1x32x96xbf16, #tpu.memory_space<vmem>>, vector<1x32x96xbf16>
    %34 = vector.shape_cast %33 : vector<1x32x96xbf16> to vector<32x96xbf16>
    %cst_18 = arith.constant dense<0.000000e+00> : vector<8x96xf32>
    %35 = tpu.matmul %32, %34, %cst_18 {dimension_numbers = #tpu.dot_dimension_numbers<[1], [0], [0], [1], [0, 0, 1, 1], [], []>} : vector<8x32xbf16>, vector<32x96xbf16>, vector<8x96xf32> -> vector<8x96xf32>
    %c0_19 = arith.constant 0 : index
    %c0_20 = arith.constant 0 : index
    %c0_21 = arith.constant 0 : index
    %36 = vector.load %arg6[%c0_19, %c0_20, %c0_21] : memref<1x1x96xf32, #tpu.memory_space<vmem>>, vector<1x1x96xf32>
    %37 = vector.shape_cast %36 : vector<1x1x96xf32> to vector<1x96xf32>
    %38 = vector.broadcast %37 : vector<1x96xf32> to vector<8x96xf32>
    %39 = arith.addf %35, %38 : vector<8x96xf32>
    %40 = vector.extract_strided_slice %39 {offsets = [0, 0], sizes = [8, 8], strides = [1, 1]} : vector<8x96xf32> to vector<8x8xf32>
    %41 = arith.truncf %40 : vector<8x8xf32> to vector<8x8xbf16>
    %42 = vector.extract_strided_slice %39 {offsets = [0, 32], sizes = [8, 8], strides = [1, 1]} : vector<8x96xf32> to vector<8x8xf32>
    %43 = arith.truncf %42 : vector<8x8xf32> to vector<8x8xbf16>
    %44 = vector.extract_strided_slice %39 {offsets = [0, 64], sizes = [8, 8], strides = [1, 1]} : vector<8x96xf32> to vector<8x8xf32>
    %45 = arith.truncf %44 : vector<8x8xf32> to vector<8x8xbf16>
    %cst_22 = arith.constant dense<0.000000e+00> : vector<8x8xf32>
    %46 = tpu.matmul %41, %43, %cst_22 {dimension_numbers = #tpu.dot_dimension_numbers<[1], [1], [0], [0], [0, 0, 1, 0], [], []>} : vector<8x8xbf16>, vector<8x8xbf16>, vector<8x8xf32> -> vector<8x8xf32>
    %47 = arith.addf %46, %5 : vector<8x8xf32>
    %cst_23 = arith.constant dense<0xFF800000> : vector<8xf32>
    %48 = vector.multi_reduction <maximumf>, %47, %cst_23 [1] : vector<8x8xf32> to vector<8xf32>
    %49 = vector.shape_cast %48 : vector<8xf32> to vector<8x1xf32>
    %50 = vector.broadcast %49 : vector<8x1xf32> to vector<8x8xf32>
    %51 = arith.subf %47, %50 : vector<8x8xf32>
    %52 = math.exp %51 : vector<8x8xf32>
    %cst_24 = arith.constant dense<0.000000e+00> : vector<8xf32>
    %53 = vector.multi_reduction <add>, %52, %cst_24 [1] : vector<8x8xf32> to vector<8xf32>
    %54 = vector.shape_cast %53 : vector<8xf32> to vector<8x1xf32>
    %55 = tpu.reciprocal %54 {approx = true} : vector<8x1xf32> -> vector<8x1xf32>
    %56 = vector.broadcast %55 : vector<8x1xf32> to vector<8x8xf32>
    %57 = arith.mulf %52, %56 : vector<8x8xf32>
    %58 = arith.truncf %57 : vector<8x8xf32> to vector<8x8xbf16>
    %cst_25 = arith.constant dense<0.000000e+00> : vector<8x8xf32>
    %59 = tpu.matmul %58, %45, %cst_25 {dimension_numbers = #tpu.dot_dimension_numbers<[1], [0], [0], [1], [0, 0, 1, 1], [], []>} : vector<8x8xbf16>, vector<8x8xbf16>, vector<8x8xf32> -> vector<8x8xf32>
    %60 = vector.extract_strided_slice %39 {offsets = [0, 8], sizes = [8, 8], strides = [1, 1]} : vector<8x96xf32> to vector<8x8xf32>
    %61 = arith.truncf %60 : vector<8x8xf32> to vector<8x8xbf16>
    %62 = vector.extract_strided_slice %39 {offsets = [0, 40], sizes = [8, 8], strides = [1, 1]} : vector<8x96xf32> to vector<8x8xf32>
    %63 = arith.truncf %62 : vector<8x8xf32> to vector<8x8xbf16>
    %64 = vector.extract_strided_slice %39 {offsets = [0, 72], sizes = [8, 8], strides = [1, 1]} : vector<8x96xf32> to vector<8x8xf32>
    %65 = arith.truncf %64 : vector<8x8xf32> to vector<8x8xbf16>
    %cst_26 = arith.constant dense<0.000000e+00> : vector<8x8xf32>
    %66 = tpu.matmul %61, %63, %cst_26 {dimension_numbers = #tpu.dot_dimension_numbers<[1], [1], [0], [0], [0, 0, 1, 0], [], []>} : vector<8x8xbf16>, vector<8x8xbf16>, vector<8x8xf32> -> vector<8x8xf32>
    %67 = arith.addf %66, %5 : vector<8x8xf32>
    %cst_27 = arith.constant dense<0xFF800000> : vector<8xf32>
    %68 = vector.multi_reduction <maximumf>, %67, %cst_27 [1] : vector<8x8xf32> to vector<8xf32>
    %69 = vector.shape_cast %68 : vector<8xf32> to vector<8x1xf32>
    %70 = vector.broadcast %69 : vector<8x1xf32> to vector<8x8xf32>
    %71 = arith.subf %67, %70 : vector<8x8xf32>
    %72 = math.exp %71 : vector<8x8xf32>
    %cst_28 = arith.constant dense<0.000000e+00> : vector<8xf32>
    %73 = vector.multi_reduction <add>, %72, %cst_28 [1] : vector<8x8xf32> to vector<8xf32>
    %74 = vector.shape_cast %73 : vector<8xf32> to vector<8x1xf32>
    %75 = tpu.reciprocal %74 {approx = true} : vector<8x1xf32> -> vector<8x1xf32>
    %76 = vector.broadcast %75 : vector<8x1xf32> to vector<8x8xf32>
    %77 = arith.mulf %72, %76 : vector<8x8xf32>
    %78 = arith.truncf %77 : vector<8x8xf32> to vector<8x8xbf16>
    %cst_29 = arith.constant dense<0.000000e+00> : vector<8x8xf32>
    %79 = tpu.matmul %78, %65, %cst_29 {dimension_numbers = #tpu.dot_dimension_numbers<[1], [0], [0], [1], [0, 0, 1, 1], [], []>} : vector<8x8xbf16>, vector<8x8xbf16>, vector<8x8xf32> -> vector<8x8xf32>
    %80 = vector.extract_strided_slice %39 {offsets = [0, 16], sizes = [8, 8], strides = [1, 1]} : vector<8x96xf32> to vector<8x8xf32>
    %81 = arith.truncf %80 : vector<8x8xf32> to vector<8x8xbf16>
    %82 = vector.extract_strided_slice %39 {offsets = [0, 48], sizes = [8, 8], strides = [1, 1]} : vector<8x96xf32> to vector<8x8xf32>
    %83 = arith.truncf %82 : vector<8x8xf32> to vector<8x8xbf16>
    %84 = vector.extract_strided_slice %39 {offsets = [0, 80], sizes = [8, 8], strides = [1, 1]} : vector<8x96xf32> to vector<8x8xf32>
    %85 = arith.truncf %84 : vector<8x8xf32> to vector<8x8xbf16>
    %cst_30 = arith.constant dense<0.000000e+00> : vector<8x8xf32>
    %86 = tpu.matmul %81, %83, %cst_30 {dimension_numbers = #tpu.dot_dimension_numbers<[1], [1], [0], [0], [0, 0, 1, 0], [], []>} : vector<8x8xbf16>, vector<8x8xbf16>, vector<8x8xf32> -> vector<8x8xf32>
    %87 = arith.addf %86, %5 : vector<8x8xf32>
    %cst_31 = arith.constant dense<0xFF800000> : vector<8xf32>
    %88 = vector.multi_reduction <maximumf>, %87, %cst_31 [1] : vector<8x8xf32> to vector<8xf32>
    %89 = vector.shape_cast %88 : vector<8xf32> to vector<8x1xf32>
    %90 = vector.broadcast %89 : vector<8x1xf32> to vector<8x8xf32>
    %91 = arith.subf %87, %90 : vector<8x8xf32>
    %92 = math.exp %91 : vector<8x8xf32>
    %cst_32 = arith.constant dense<0.000000e+00> : vector<8xf32>
    %93 = vector.multi_reduction <add>, %92, %cst_32 [1] : vector<8x8xf32> to vector<8xf32>
    %94 = vector.shape_cast %93 : vector<8xf32> to vector<8x1xf32>
    %95 = tpu.reciprocal %94 {approx = true} : vector<8x1xf32> -> vector<8x1xf32>
    %96 = vector.broadcast %95 : vector<8x1xf32> to vector<8x8xf32>
    %97 = arith.mulf %92, %96 : vector<8x8xf32>
    %98 = arith.truncf %97 : vector<8x8xf32> to vector<8x8xbf16>
    %cst_33 = arith.constant dense<0.000000e+00> : vector<8x8xf32>
    %99 = tpu.matmul %98, %85, %cst_33 {dimension_numbers = #tpu.dot_dimension_numbers<[1], [0], [0], [1], [0, 0, 1, 1], [], []>} : vector<8x8xbf16>, vector<8x8xbf16>, vector<8x8xf32> -> vector<8x8xf32>
    %100 = vector.extract_strided_slice %39 {offsets = [0, 24], sizes = [8, 8], strides = [1, 1]} : vector<8x96xf32> to vector<8x8xf32>
    %101 = arith.truncf %100 : vector<8x8xf32> to vector<8x8xbf16>
    %102 = vector.extract_strided_slice %39 {offsets = [0, 56], sizes = [8, 8], strides = [1, 1]} : vector<8x96xf32> to vector<8x8xf32>
    %103 = arith.truncf %102 : vector<8x8xf32> to vector<8x8xbf16>
    %104 = vector.extract_strided_slice %39 {offsets = [0, 88], sizes = [8, 8], strides = [1, 1]} : vector<8x96xf32> to vector<8x8xf32>
    %105 = arith.truncf %104 : vector<8x8xf32> to vector<8x8xbf16>
    %cst_34 = arith.constant dense<0.000000e+00> : vector<8x8xf32>
    %106 = tpu.matmul %101, %103, %cst_34 {dimension_numbers = #tpu.dot_dimension_numbers<[1], [1], [0], [0], [0, 0, 1, 0], [], []>} : vector<8x8xbf16>, vector<8x8xbf16>, vector<8x8xf32> -> vector<8x8xf32>
    %107 = arith.addf %106, %5 : vector<8x8xf32>
    %cst_35 = arith.constant dense<0xFF800000> : vector<8xf32>
    %108 = vector.multi_reduction <maximumf>, %107, %cst_35 [1] : vector<8x8xf32> to vector<8xf32>
    %109 = vector.shape_cast %108 : vector<8xf32> to vector<8x1xf32>
    %110 = vector.broadcast %109 : vector<8x1xf32> to vector<8x8xf32>
    %111 = arith.subf %107, %110 : vector<8x8xf32>
    %112 = math.exp %111 : vector<8x8xf32>
    %cst_36 = arith.constant dense<0.000000e+00> : vector<8xf32>
    %113 = vector.multi_reduction <add>, %112, %cst_36 [1] : vector<8x8xf32> to vector<8xf32>
    %114 = vector.shape_cast %113 : vector<8xf32> to vector<8x1xf32>
    %115 = tpu.reciprocal %114 {approx = true} : vector<8x1xf32> -> vector<8x1xf32>
    %116 = vector.broadcast %115 : vector<8x1xf32> to vector<8x8xf32>
    %117 = arith.mulf %112, %116 : vector<8x8xf32>
    %118 = arith.truncf %117 : vector<8x8xf32> to vector<8x8xbf16>
    %cst_37 = arith.constant dense<0.000000e+00> : vector<8x8xf32>
    %119 = tpu.matmul %118, %105, %cst_37 {dimension_numbers = #tpu.dot_dimension_numbers<[1], [0], [0], [1], [0, 0, 1, 1], [], []>} : vector<8x8xbf16>, vector<8x8xbf16>, vector<8x8xf32> -> vector<8x8xf32>
    %120 = tpu.concatenate %59, %79, %99, %119 in 1 : vector<8x8xf32>, vector<8x8xf32>, vector<8x8xf32>, vector<8x8xf32> -> vector<8x32xf32>
    %121 = arith.truncf %120 : vector<8x32xf32> to vector<8x32xbf16>
    %c0_38 = arith.constant 0 : index
    %c0_39 = arith.constant 0 : index
    %c0_40 = arith.constant 0 : index
    %122 = vector.load %arg7[%c0_38, %c0_39, %c0_40] : memref<1x32x32xbf16, #tpu.memory_space<vmem>>, vector<1x32x32xbf16>
    %123 = vector.shape_cast %122 : vector<1x32x32xbf16> to vector<32x32xbf16>
    %cst_41 = arith.constant dense<0.000000e+00> : vector<8x32xf32>
    %124 = tpu.matmul %121, %123, %cst_41 {dimension_numbers = #tpu.dot_dimension_numbers<[1], [0], [0], [1], [0, 0, 1, 1], [], []>} : vector<8x32xbf16>, vector<32x32xbf16>, vector<8x32xf32> -> vector<8x32xf32>
    %c0_42 = arith.constant 0 : index
    %c0_43 = arith.constant 0 : index
    %c0_44 = arith.constant 0 : index
    %125 = vector.load %arg8[%c0_42, %c0_43, %c0_44] : memref<1x1x32xf32, #tpu.memory_space<vmem>>, vector<1x1x32xf32>
    %126 = vector.shape_cast %125 : vector<1x1x32xf32> to vector<1x32xf32>
    %127 = vector.broadcast %126 : vector<1x32xf32> to vector<8x32xf32>
    %128 = arith.addf %124, %127 : vector<8x32xf32>
    %129 = arith.addf %4, %128 : vector<8x32xf32>
    %c0_45 = arith.constant 0 : index
    %c0_46 = arith.constant 0 : index
    %c0_47 = arith.constant 0 : index
    %130 = vector.load %arg9[%c0_45, %c0_46, %c0_47] : memref<1x1x32xf32, #tpu.memory_space<vmem>>, vector<1x1x32xf32>
    %131 = vector.shape_cast %130 : vector<1x1x32xf32> to vector<1x32xf32>
    %c0_48 = arith.constant 0 : index
    %c0_49 = arith.constant 0 : index
    %c0_50 = arith.constant 0 : index
    %132 = vector.load %arg10[%c0_48, %c0_49, %c0_50] : memref<1x1x32xf32, #tpu.memory_space<vmem>>, vector<1x1x32xf32>
    %133 = vector.shape_cast %132 : vector<1x1x32xf32> to vector<1x32xf32>
    %cst_51 = arith.constant dense<0.000000e+00> : vector<8xf32>
    %134 = vector.multi_reduction <add>, %129, %cst_51 [1] : vector<8x32xf32> to vector<8xf32>
    %135 = vector.shape_cast %134 : vector<8xf32> to vector<8x1xf32>
    %cst_52 = arith.constant 3.200000e+01 : f32
    %136 = vector.broadcast %cst_52 : f32 to vector<8x1xf32>
    %137 = arith.divf %135, %136 : vector<8x1xf32>
    %138 = arith.mulf %129, %129 : vector<8x32xf32>
    %cst_53 = arith.constant dense<0.000000e+00> : vector<8xf32>
    %139 = vector.multi_reduction <add>, %138, %cst_53 [1] : vector<8x32xf32> to vector<8xf32>
    %140 = vector.shape_cast %139 : vector<8xf32> to vector<8x1xf32>
    %cst_54 = arith.constant 3.200000e+01 : f32
    %141 = vector.broadcast %cst_54 : f32 to vector<8x1xf32>
    %142 = arith.divf %140, %141 : vector<8x1xf32>
    %143 = arith.mulf %137, %137 : vector<8x1xf32>
    %144 = arith.subf %142, %143 : vector<8x1xf32>
    %145 = vector.broadcast %137 : vector<8x1xf32> to vector<8x32xf32>
    %146 = arith.subf %129, %145 : vector<8x32xf32>
    %cst_55 = arith.constant 9.99999974E-6 : f32
    %147 = vector.broadcast %cst_55 : f32 to vector<8x1xf32>
    %148 = arith.addf %144, %147 : vector<8x1xf32>
    %149 = math.rsqrt %148 : vector<8x1xf32>
    %150 = vector.broadcast %149 : vector<8x1xf32> to vector<8x32xf32>
    %151 = arith.mulf %146, %150 : vector<8x32xf32>
    %152 = vector.broadcast %131 : vector<1x32xf32> to vector<8x32xf32>
    %153 = arith.mulf %151, %152 : vector<8x32xf32>
    %154 = vector.broadcast %133 : vector<1x32xf32> to vector<8x32xf32>
    %155 = arith.addf %153, %154 : vector<8x32xf32>
    %156 = arith.truncf %155 : vector<8x32xf32> to vector<8x32xbf16>
    %c0_56 = arith.constant 0 : index
    %c0_57 = arith.constant 0 : index
    %c0_58 = arith.constant 0 : index
    %157 = vector.load %arg11[%c0_56, %c0_57, %c0_58] : memref<1x32x128xbf16, #tpu.memory_space<vmem>>, vector<1x32x128xbf16>
    %158 = vector.shape_cast %157 : vector<1x32x128xbf16> to vector<32x128xbf16>
    %cst_59 = arith.constant dense<0.000000e+00> : vector<8x128xf32>
    %159 = tpu.matmul %156, %158, %cst_59 {dimension_numbers = #tpu.dot_dimension_numbers<[1], [0], [0], [1], [0, 0, 1, 1], [], []>} : vector<8x32xbf16>, vector<32x128xbf16>, vector<8x128xf32> -> vector<8x128xf32>
    %c0_60 = arith.constant 0 : index
    %c0_61 = arith.constant 0 : index
    %c0_62 = arith.constant 0 : index
    %160 = vector.load %arg12[%c0_60, %c0_61, %c0_62] : memref<1x1x128xf32, #tpu.memory_space<vmem>>, vector<1x1x128xf32>
    %161 = vector.shape_cast %160 : vector<1x1x128xf32> to vector<1x128xf32>
    %162 = vector.broadcast %161 : vector<1x128xf32> to vector<8x128xf32>
    %163 = arith.addf %159, %162 : vector<8x128xf32>
    %cst_63 = arith.constant 5.000000e-01 : f32
    %164 = vector.broadcast %cst_63 : f32 to vector<8x128xf32>
    %165 = arith.mulf %164, %163 : vector<8x128xf32>
    %cst_64 = arith.constant 4.471500e-02 : f32
    %166 = vector.broadcast %cst_64 : f32 to vector<8x128xf32>
    %167 = arith.mulf %166, %163 : vector<8x128xf32>
    %168 = arith.mulf %167, %163 : vector<8x128xf32>
    %169 = arith.mulf %168, %163 : vector<8x128xf32>
    %170 = arith.addf %163, %169 : vector<8x128xf32>
    %cst_65 = arith.constant 0.797884583 : f32
    %171 = vector.broadcast %cst_65 : f32 to vector<8x128xf32>
    %172 = arith.mulf %171, %170 : vector<8x128xf32>
    %173 = math.tanh %172 : vector<8x128xf32>
    %cst_66 = arith.constant 1.000000e+00 : f32
    %174 = vector.broadcast %cst_66 : f32 to vector<8x128xf32>
    %175 = arith.addf %174, %173 : vector<8x128xf32>
    %176 = arith.mulf %165, %175 : vector<8x128xf32>
    %177 = arith.truncf %176 : vector<8x128xf32> to vector<8x128xbf16>
    %c0_67 = arith.constant 0 : index
    %c0_68 = arith.constant 0 : index
    %c0_69 = arith.constant 0 : index
    %178 = vector.load %arg13[%c0_67, %c0_68, %c0_69] : memref<1x128x32xbf16, #tpu.memory_space<vmem>>, vector<1x128x32xbf16>
    %179 = vector.shape_cast %178 : vector<1x128x32xbf16> to vector<128x32xbf16>
    %cst_70 = arith.constant dense<0.000000e+00> : vector<8x32xf32>
    %180 = tpu.matmul %177, %179, %cst_70 {dimension_numbers = #tpu.dot_dimension_numbers<[1], [0], [0], [1], [0, 0, 1, 1], [], []>} : vector<8x128xbf16>, vector<128x32xbf16>, vector<8x32xf32> -> vector<8x32xf32>
    %c0_71 = arith.constant 0 : index
    %c0_72 = arith.constant 0 : index
    %c0_73 = arith.constant 0 : index
    %181 = vector.load %arg14[%c0_71, %c0_72, %c0_73] : memref<1x1x32xf32, #tpu.memory_space<vmem>>, vector<1x1x32xf32>
    %182 = vector.shape_cast %181 : vector<1x1x32xf32> to vector<1x32xf32>
    %183 = vector.broadcast %182 : vector<1x32xf32> to vector<8x32xf32>
    %184 = arith.addf %180, %183 : vector<8x32xf32>
    %185 = arith.addf %129, %184 : vector<8x32xf32>
    %c0_74 = arith.constant 0 : index
    %c0_75 = arith.constant 0 : index
    %c0_76 = arith.constant 0 : index
    %186 = vector.load %arg17[%c0_74, %c0_75, %c0_76] : memref<1x8x32xf32, #tpu.memory_space<vmem>>, vector<1x8x32xf32>
    %187 = vector.shape_cast %186 : vector<1x8x32xf32> to vector<8x32xf32>
    %188 = vector.shape_cast %185 : vector<8x32xf32> to vector<1x8x32xf32>
    tpu.vector_store %arg17[%c0_74, %c0_75, %c0_76], %188 {strides = array<i32>} : memref<1x8x32xf32, #tpu.memory_space<vmem>>, vector<1x8x32xf32>,
    %c1_i32 = arith.constant 1 : i32
    %189 = arith.cmpi eq, %arg1, %c1_i32 : i32
    %190 = arith.extui %189 : i1 to i32
    %c0_i32_77 = arith.constant 0 : i32
    %191 = arith.cmpi ne, %190, %c0_i32_77 : i32
    scf.if %191 {
      %c0_78 = arith.constant 0 : index
      %c0_79 = arith.constant 0 : index
      %192 = vector.load %arg15[%c0_78, %c0_79] : memref<1x32xf32, #tpu.memory_space<vmem>>, vector<1x32xf32>
      %c0_80 = arith.constant 0 : index
      %c0_81 = arith.constant 0 : index
      %193 = vector.load %arg16[%c0_80, %c0_81] : memref<1x32xf32, #tpu.memory_space<vmem>>, vector<1x32xf32>
      %cst_82 = arith.constant dense<0.000000e+00> : vector<8xf32>
      %194 = vector.multi_reduction <add>, %185, %cst_82 [1] : vector<8x32xf32> to vector<8xf32>
      %195 = vector.shape_cast %194 : vector<8xf32> to vector<8x1xf32>
      %cst_83 = arith.constant 3.200000e+01 : f32
      %196 = vector.broadcast %cst_83 : f32 to vector<8x1xf32>
      %197 = arith.divf %195, %196 : vector<8x1xf32>
      %198 = arith.mulf %185, %185 : vector<8x32xf32>
      %cst_84 = arith.constant dense<0.000000e+00> : vector<8xf32>
      %199 = vector.multi_reduction <add>, %198, %cst_84 [1] : vector<8x32xf32> to vector<8xf32>
      %200 = vector.shape_cast %199 : vector<8xf32> to vector<8x1xf32>
      %cst_85 = arith.constant 3.200000e+01 : f32
      %201 = vector.broadcast %cst_85 : f32 to vector<8x1xf32>
      %202 = arith.divf %200, %201 : vector<8x1xf32>
      %203 = arith.mulf %197, %197 : vector<8x1xf32>
      %204 = arith.subf %202, %203 : vector<8x1xf32>
      %205 = vector.broadcast %197 : vector<8x1xf32> to vector<8x32xf32>
      %206 = arith.subf %185, %205 : vector<8x32xf32>
      %cst_86 = arith.constant 9.99999974E-6 : f32
      %207 = vector.broadcast %cst_86 : f32 to vector<8x1xf32>
      %208 = arith.addf %204, %207 : vector<8x1xf32>
      %209 = math.rsqrt %208 : vector<8x1xf32>
      %210 = vector.broadcast %209 : vector<8x1xf32> to vector<8x32xf32>
      %211 = arith.mulf %206, %210 : vector<8x32xf32>
      %212 = vector.broadcast %192 : vector<1x32xf32> to vector<8x32xf32>
      %213 = arith.mulf %211, %212 : vector<8x32xf32>
      %214 = vector.broadcast %193 : vector<1x32xf32> to vector<8x32xf32>
      %215 = arith.addf %213, %214 : vector<8x32xf32>
      %c0_87 = arith.constant 0 : index
      %c0_88 = arith.constant 0 : index
      %c0_89 = arith.constant 0 : index
      %216 = vector.load %arg17[%c0_87, %c0_88, %c0_89] : memref<1x8x32xf32, #tpu.memory_space<vmem>>, vector<1x8x32xf32>
      %217 = vector.shape_cast %216 : vector<1x8x32xf32> to vector<8x32xf32>
      %218 = vector.shape_cast %215 : vector<8x32xf32> to vector<1x8x32xf32>
      tpu.vector_store %arg17[%c0_87, %c0_88, %c0_89], %218 {strides = array<i32>} : memref<1x8x32xf32, #tpu.memory_space<vmem>>, vector<1x8x32xf32>,
    } else {
    }
    return
  }
  func.func @transform_0(%arg0: i32, %arg1: i32) -> (i32, i32, i32) {
    %c0_i32 = arith.constant 0 : i32
    %c0_i32_0 = arith.constant 0 : i32
    %c0_i32_1 = arith.constant 0 : i32
    return %arg0, %c0_i32, %c0_i32_0 : i32, i32, i32
  }
  func.func @transform_1(%arg0: i32, %arg1: i32) -> (i32, i32, i32) {
    %c0_i32 = arith.constant 0 : i32
    %c0_i32_0 = arith.constant 0 : i32
    %c0_i32_1 = arith.constant 0 : i32
    return %arg1, %c0_i32, %c0_i32_0 : i32, i32, i32
  }
  func.func @transform_2(%arg0: i32, %arg1: i32) -> (i32, i32, i32) {
    %c0_i32 = arith.constant 0 : i32
    %c0_i32_0 = arith.constant 0 : i32
    %c0_i32_1 = arith.constant 0 : i32
    return %arg1, %c0_i32, %c0_i32_0 : i32, i32, i32
  }
  func.func @transform_3(%arg0: i32, %arg1: i32) -> (i32, i32, i32) {
    %c0_i32 = arith.constant 0 : i32
    %c0_i32_0 = arith.constant 0 : i32
    %c0_i32_1 = arith.constant 0 : i32
    return %arg1, %c0_i32, %c0_i32_0 : i32, i32, i32
  }
  func.func @transform_4(%arg0: i32, %arg1: i32) -> (i32, i32, i32) {
    %c0_i32 = arith.constant 0 : i32
    %c0_i32_0 = arith.constant 0 : i32
    %c0_i32_1 = arith.constant 0 : i32
    return %arg1, %c0_i32, %c0_i32_0 : i32, i32, i32
  }
  func.func @transform_5(%arg0: i32, %arg1: i32) -> (i32, i32, i32) {
    %c0_i32 = arith.constant 0 : i32
    %c0_i32_0 = arith.constant 0 : i32
    %c0_i32_1 = arith.constant 0 : i32
    return %arg1, %c0_i32, %c0_i32_0 : i32, i32, i32
  }
  func.func @transform_6(%arg0: i32, %arg1: i32) -> (i32, i32, i32) {
    %c0_i32 = arith.constant 0 : i32
    %c0_i32_0 = arith.constant 0 : i32
    %c0_i32_1 = arith.constant 0 : i32
    return %arg1, %c0_i32, %c0_i32_0 : i32, i32, i32
  }
  func.func @transform_7(%arg0: i32, %arg1: i32) -> (i32, i32, i32) {
    %c0_i32 = arith.constant 0 : i32
    %c0_i32_0 = arith.constant 0 : i32
    %c0_i32_1 = arith.constant 0 : i32
    return %arg1, %c0_i32, %c0_i32_0 : i32, i32, i32
  }
  func.func @transform_8(%arg0: i32, %arg1: i32) -> (i32, i32, i32) {
    %c0_i32 = arith.constant 0 : i32
    %c0_i32_0 = arith.constant 0 : i32
    %c0_i32_1 = arith.constant 0 : i32
    return %arg1, %c0_i32, %c0_i32_0 : i32, i32, i32
  }
  func.func @transform_9(%arg0: i32, %arg1: i32) -> (i32, i32, i32) {
    %c0_i32 = arith.constant 0 : i32
    %c0_i32_0 = arith.constant 0 : i32
    %c0_i32_1 = arith.constant 0 : i32
    return %arg1, %c0_i32, %c0_i32_0 : i32, i32, i32
  }
  func.func @transform_10(%arg0: i32, %arg1: i32) -> (i32, i32, i32) {
    %c0_i32 = arith.constant 0 : i32
    %c0_i32_0 = arith.constant 0 : i32
    %c0_i32_1 = arith.constant 0 : i32
    return %arg1, %c0_i32, %c0_i32_0 : i32, i32, i32
  }
  func.func @transform_11(%arg0: i32, %arg1: i32) -> (i32, i32, i32) {
    %c0_i32 = arith.constant 0 : i32
    %c0_i32_0 = arith.constant 0 : i32
    %c0_i32_1 = arith.constant 0 : i32
    return %arg1, %c0_i32, %c0_i32_0 : i32, i32, i32
  }
  func.func @transform_12(%arg0: i32, %arg1: i32) -> (i32, i32, i32) {
    %c0_i32 = arith.constant 0 : i32
    %c0_i32_0 = arith.constant 0 : i32
    %c0_i32_1 = arith.constant 0 : i32
    return %arg1, %c0_i32, %c0_i32_0 : i32, i32, i32
  }
  func.func @transform_13(%arg0: i32, %arg1: i32) -> (i32, i32) {
    %c0_i32 = arith.constant 0 : i32
    %c0_i32_0 = arith.constant 0 : i32
    %c0_i32_1 = arith.constant 0 : i32
    return %c0_i32, %c0_i32_0 : i32, i32
  }
  func.func @transform_14(%arg0: i32, %arg1: i32) -> (i32, i32) {
    %c0_i32 = arith.constant 0 : i32
    %c0_i32_0 = arith.constant 0 : i32
    %c0_i32_1 = arith.constant 0 : i32
    return %c0_i32, %c0_i32_0 : i32, i32
  }
  func.func @transform_15(%arg0: i32, %arg1: i32) -> (i32, i32, i32) {
    %c0_i32 = arith.constant 0 : i32
    %c0_i32_0 = arith.constant 0 : i32
    %c0_i32_1 = arith.constant 0 : i32
    return %arg0, %c0_i32, %c0_i32_0 : i32, i32, i32
  }
}

</mosaic_0001>

<bundles_post_ra>
// kernel: tpu_custom_call.1
= control target key start
LH: loop header
LB: loop body
LE: loop exit
PB: predicated region body
PF: predicated region fallthrough
CT: control target
= control target key end

     0   :  { %s2225_s0 = inlined_call_operand.vmem [shape: f32[2,8,32], index: 0, kind: input, shape index: {}]   ;;  %s2226_s1 = inlined_call_operand.vmem [shape: f32[2,1,32], index: 1, kind: input, shape index: {}]   ;;  %s2227_s2 = inlined_call_operand.vmem [shape: f32[2,1,32], index: 2, kind: input, shape index: {}]   ;;  %s2228_s3 = inlined_call_operand.vmem [shape: bf16[2,32,96], index: 3, kind: input, shape index: {}]   ;;  %s2229_s4 = inlined_call_operand.vmem [shape: f32[2,1,96], index: 4, kind: input, shape index: {}]   ;;  %s2230_s5 = inlined_call_operand.vmem [shape: bf16[2,32,32], index: 5, kind: input, shape index: {}]   ;;  %s2231_s6 = inlined_call_operand.vmem [shape: f32[2,1,32], index: 6, kind: input, shape index: {}]   ;;  %s2232_s7 = inlined_call_operand.vmem [shape: f32[2,1,32], index: 7, kind: input, shape index: {}]   ;;  %s2233_s8 = inlined_call_operand.vmem [shape: f32[2,1,32], index: 8, kind: input, shape index: {}]   ;;  %s2234_s9 = inlined_call_operand.vmem [shape: bf16[2,32,128], index: 9, kind: input, shape index: {}]   ;;  %s2235_s10 = inlined_call_operand.vmem [shape: f32[2,1,128], index: 10, kind: input, shape index: {}]   ;;  %s2236_s11 = inlined_call_operand.vmem [shape: bf16[2,128,32], index: 11, kind: input, shape index: {}]   ;;  %s2237_s12 = inlined_call_operand.vmem [shape: f32[2,1,32], index: 12, kind: input, shape index: {}]   ;;  %s2238_s13 = inlined_call_operand.vmem [shape: f32[1,32], index: 13, kind: input, shape index: {}]   ;;  %s2239_s14 = inlined_call_operand.vmem [shape: f32[1,32], index: 14, kind: input, shape index: {}]   ;;  %s2240_s15 = inlined_call_operand.hbm [shape: f32[2,8,32], index: 15, kind: output, shape index: {}]  }
   0x1   :  { %2256 = sst [smem:[#allocation19_spill]] %s2225_s0 }
   0x2   :  { %2257 = sst [smem:[#allocation20_spill]] %s2228_s3 }
   0x3   :  { %2258 = sst [smem:[#allocation21_spill]] %s2230_s5 }
   0x4   :  { %2259 = sst [smem:[#allocation22_spill]] %s2232_s7 }
   0x5   :  { %2260 = sst [smem:[#allocation23_spill]] %s2236_s11 }
   0x6   :  { %2261 = sst [smem:[#allocation24_spill]] %s2238_s13 }
   0x7   :  { %2262 = sst [smem:[#allocation25_spill]] %s2239_s14 }
   0x8   :  { %2263 = sst [smem:[#allocation26_spill]] %s2240_s15 }
   0x9   :  { %20 = vsyncpa [#allocation4], 0 }
   0xa   :  { %22 = vsyncpa [#allocation4 + $0x1], 0  ;;  %s1902_s18 = smov 0   ;;  %s1904_s19 = smov 0  }
   0xb   :  { %s1906_s20 = smov 0   ;;  %s1908_s21 = smov 0  }
   0xc   :  { %s1910_s22 = smov 0   ;;  %s1912_s23 = smov 0  }
   0xd   :  { %s1914_s24 = smov 0   ;;  %s1916_s25 = smov 0  }
   0xe LB: > { %2264 = sst [smem:[#allocation6_spill]] %s1776_s18  ;;  %s1481_s26 = sadd.s32 4294967295, %s1804_s25   ;;  %s1804_s25 = sphi %s1916_s25, %s28_s25   ;;  %s1800_s24 = sphi %s1914_s24, %s2308_s24   ;;  %s1796_s23 = sphi %s1912_s23, %s2307_s23   ;;  %s1792_s22 = sphi %s1910_s22, %s2306_s22   ;;  %s1788_s21 = sphi %s1908_s21, %s2305_s21   ;;  %s1784_s20 = sphi %s1906_s20, %s2304_s20   ;;  %s1780_s19 = sphi %s1904_s19, %s2303_s19   ;;  %s1776_s18 = sphi %s1902_s18, %s2302_s18  }
   0xf   : > { %2265 = sst [smem:[#allocation7_spill]] %s1780_s19  ;;  %s1482_s27 = sadd.s32 4294967294, %s1804_s25  }
  0x10   : > { %2266 = sst [smem:[#allocation8_spill]] %s1784_s20  ;;  %s37_s28 = sadd.s32 1, %s1796_s23 }
  0x11   : > { %2267 = sst [smem:[#allocation9_spill]] %s1788_s21  ;;  %p38_p0 = scmp.ge.s32.totalorder %s37_s28, 2 }
  0x12   : > { %2268 = sst [smem:[#allocation10_spill]] %s1792_s22  ;;  %s40_s29 = sadd.s32 1, %s1800_s24 }
  0x13   : > { %2269 = sst [smem:[#allocation11_spill]] %s1796_s23  ;;  %p437_p1 = scmp.ne.s32.totalorder %s1784_s20, %s1780_s19 }
  0x14   : > { %2270 = sst [smem:[#allocation12_spill]] %s1800_s24  ;;  %p438_p2 = scmp.eq.s32.totalorder %s1481_s26, 3 }
  0x15   : > { %2271 = sst [smem:[#allocation13_spill]] %s1804_s25  ;;  %s2310_s28 = smov (%p38_p0, %s37_s28), 0 }
  0x16   : > { %2272 = sst [smem:[#allocation14_spill]] %s2310_s28  ;;  %s2312_s29 = smov (!%p38_p0, %s40_s29), %s1800_s24 }
  0x17   : > { %p1951_p3 = por %p438_p2, %p437_p1  ;;  %p443_p4 = scmp.ne.s32.totalorder %s1780_s19, %s1776_s18 }
  0x18   : > { %p42_p5 = scmp.ge.s32.totalorder %s2312_s29, 2  ;;  %p444_p6 = scmp.eq.s32.totalorder %s1482_s27, 3 }
  0x19   : > { %s2273_s30 = scalar_select %p1951_p3, 1, 0 }
  0x1a   : > { %p1485_p7 = scmp.ge.s32.totalorder %s1804_s25, 1  ;;  %p555_p8 = scmp.lt.s32.totalorder %s1804_s25, 5 }
  0x1b   : > { %2274 = sst [smem:[#allocation15_spill]] %s2273_s30  ;;  %s2314_s29 = smov (%p42_p5, %s2312_s29), 0 }
  0x1c   : > { %2275 = sst [smem:[#allocation16_spill]] %s2314_s29  ;;  %p1961_p9 = por %p444_p6, %p443_p4 }
  0x1d   : > { %p556_p10 = pnand %p1485_p7, %p555_p8  ;;  %s424_s17 = ssub.s32 %s1800_s24, %s2314_s29 }
  0x1e   : > { %s2276_s16 = scalar_select %p1961_p9, 1, 0 }
  0x1f   : > { %s427_s26 = sadd.s32 1, %s1784_s20  ;;  %p425_p11 = scmp.eq.s32.totalorder %s424_s17, 0 }
  0x20   : > { %2277 = sst [smem:[#allocation17_spill]] %s2276_s16  ;;  %559 = sbr.rel (%p556_p10) target bundleno = 2310 (0x906), region = 80 }
  0x21   : > { %s1969_s28 = scalar_select %p425_p11, %s1784_s20, %s427_s26  }
  0x22   : > { %s2246_s27 = sand.u32 (!%p556_p10), 1, %s1780_s19   ;;  %p646_p12 = scmp.lt.s32.totalorder (!%p556_p10), %s1792_s22, 1 }
  0x23   : > { %2278 = sst [smem:[#allocation18_spill]] %s1969_s28  ;;  %s1486_s23 = sshll.u32 (!%p556_p10), %s2246_s27, 3 }
  0x24   : > { %p650_p13 = scmp.lt.s32.totalorder (!%p556_p10), %s1788_s21, 1  ;;  %s2279_s0 = sld [smem:[#allocation19_spill]] (!%p556_p10) }
  0x25   : > { %s647_s18 = scalar_select %p646_p12, %s1792_s22, 1 }
  0x26   : > { %s1978_s16 = scalar_select %p650_p13, %s1788_s21, 1 }
  0x27   : > { %s1487_s17 = sshll.u32 %s647_s18, 3  ;;  %s2280_s3 = sld [smem:[#allocation20_spill]] }
  0x28   : > { %s1569_s19 = sshll.u32 %s1978_s16, 4  ;;  %s2281_s5 = sld [smem:[#allocation21_spill]] }
  0x29   : > { %s2021_s18 = scalar_lea.vmem %s2234_s9, %s1569_s19  ;;  %s685_s11 = scalar_lea.vmem %s2235_s10, %s1978_s16 }
  0x2a   : > { %s649_s24 = scalar_lea.vmem %s2279_s0, %s1487_s17  ;;  %s677_s0 = scalar_lea.vmem %s2233_s8, %s1978_s16 }
  0x2b   : > { %s693_s15 = scalar_lea.vmem %s2237_s12, %s1978_s16  ;;  %s2283_s20 = sld [smem:[#allocation23_spill]] }
  0x2c   : > { %s2037_s14 = scalar_lea.vmem [#allocation3], %s1486_s23  ;;  %s2284_s22 = sld [smem:[#allocation9_spill]] }
  0x2d   : > { %s1995_s13 = scalar_lea.vmem %s2280_s3, %s1569_s19 }
  0x2e   : > { %s2004_s26 = scalar_lea.vmem %s2281_s5, %s1569_s19  ;;  %s1572_s5 = sshll.u32 %s1978_s16, 6 }
  0x31   : > { %s2035_s7 = scalar_lea.vmem %s2283_s20, %s1572_s5 }
  0x32   : > { %p1496_p0 = scmp.ne.s32.totalorder %s2284_s22, 0 }
  0x34   : > { %698 = sbr.rel (%p1496_p0) target bundleno = 64 (0x40), region = 84 }
  0x39   : > { %v699_v0 = vld [vmem:[%s649_s24] sm:$0xff]  ;;  %vm700_vm0 = vcmask 261120   ;;  %v702_v1 = vlaneseq  ;;  %vm708_vm1 = vcmask 64512   ;;  %v1806_v4 = vmov 0.0  }
  0x3a   : > { %701 = vst.msk [vmem:[%s2037_s14] sm:$0xff] %vm700_vm0, %v699_v0 }
  0x3b   : > { %v703_v2 = vshrl.u32 %v702_v1, 7  ;;  %v705_v3 = vand.u32 127, %v702_v1 }
  0x3d   : > { %vm706_vm2 = vcmp.gt.s32.totalorder %v705_v3, %v703_v2 }
  0x3e   : > { %v707_v5 = vsel %vm706_vm2, -1e+30, %v1806_v4 }
  0x3f   : > { %709 = vst.msk [vmem:[#allocation2] sm:$0xff] %vm708_vm1, %v707_v5 }
  0x40 PF: > { %vm714_vm3 = vcmask 261120   ;;  %v1807_v10 = vmov 32.0   ;;  %v1574_v16 = vld [vmem:[%s1995_s13 + $0x8] sm:$0xff]  ;;  %v1573_v18 = vld [vmem:[%s1995_s13] sm:$0xff]  ;;  %s2285_s13 = scalar_lea.vmem %s2226_s1, %s1978_s16  ;;  %s2286_s23 = scalar_lea.vmem %s2227_s2, %s1978_s16  ;;  %vm832_vm8 = vcmask 1043456   ;;  %vm795_vm9 = vcmask 64512  }
  0x41   : > { %v2042_v6 = vld [vmem:[%s2037_s14] sm:$0xff]  ;;  %1682 = vrcp.f32 %v1807_v10  ;;  %784 = vmatpush.bf16.msra.mxu0 %v1574_v16  ;;  %v1674_v33 = vld [vmem:[%s2285_s13] ss:$0 sm:$0xff]  ;;  %s2287_s29 = scalar_lea.vmem %s2229_s4, %s1978_s16  ;;  %s1808_s17 = smov 88   ;;  %vm1030_vm10 = vcmask 130048   ;;  %vm1032_vm11 = vcmask 195584  }
  0x42   : > { %v715_v7 = vsel %vm714_vm3, %v2042_v6, 0.0  ;;  %v726_v8 = vmul.f32 %v2042_v6, %v2042_v6  ;;  %v1675_v36 = vld [vmem:[%s2286_s23] ss:$0 sm:$0xff]  ;;  %s1809_s28 = smov 64   ;;  %s1810_s27 = smov 96  }
  0x43   : > { %716 = vadd.xlane.f32.xlu0 %v715_v7  ;;  %v1676_v40 = vld [vmem:[%s2287_s29] ss:$0 sm:$0xff]  ;;  %s1811_s30 = smov 72   ;;  %s1812_s25 = smov 80  }
  0x44   : > { %v727_v9 = vsel %vm714_vm3, %v726_v8, 0.0  ;;  %s1813_s22 = smov 120   ;;  %s1814_s3 = smov 104  }
  0x45   : > { %785 = vmatpush.bf16.msra.mxu0 %v1573_v18  ;;  %s1815_s5 = smov 112   ;;  %s1816_s13 = smov 40  }
  0x46   : > { %v711_v55 = vld [vmem:[#allocation2] sm:$0xff]  ;;  %s1817_s19 = smov 48   ;;  %s1818_s20 = smov 56  }
  0x47   : > { %v1683_v11 = vpop.eup %1682  ;;  %s1819_s23 = smov 16   ;;  %s1820_s24 = smov 8  }
  0x48   : > { %v719_v12 = vmul.f32 32.0, %v1683_v11  ;;  %vm723_vm4 = vweird.f32 %v1683_v11  ;;  %s1821_s21 = smov 24  }
  0x4a   : > { %v720_v13 = vsub.f32 1.0, %v719_v12 }
  0x4b   : > { %728 = vadd.xlane.f32.xlu0 %v727_v9 }
  0x4c   : > { %v721_v14 = vmul.f32 %v1683_v11, %v720_v13 }
  0x4e   : > { %v722_v15 = vadd.f32 %v1683_v11, %v721_v14 }
  0x50   : > { %v2051_v19 = vsel %vm723_vm4, %v1683_v11, %v722_v15 }
  0xb6   : > { %v717_v17 = vpop.xlane.xlu0 %716 }
  0xb7   : > { %v725_v20 = vmul.f32 %v2051_v19, %v717_v17 }
  0xb9   : > { %v731_v22 = vmul.f32 %v725_v20, %v725_v20  ;;  %v733_v32 = vsub.f32 %v2042_v6, %v725_v20 }
  0xbe   : > { %v729_v21 = vpop.xlane.xlu0 %728 }
  0xbf   : > { %v730_v23 = vmul.f32 %v729_v21, %v2051_v19 }
  0xc1   : > { %v732_v24 = vsub.f32 %v730_v23, %v731_v22 }
  0xc3   : > { %v734_v25 = vadd.f32 1e-05, %v732_v24 }
  0xc5   : > { %1684 = vrsqrt.f32 %v734_v25  ;;  %vm741_vm6 = vweird.f32 %v734_v25 }
  0xcb   : > { %v1685_v26 = vpop.eup %1684 }
  0xcc   : > { %v736_v27 = vmul.f32 %v1685_v26, %v734_v25  ;;  %vm742_vm5 = vweird.f32 %v1685_v26 }
  0xcd   : > { %vm743_vm7 = vmor %vm741_vm6, %vm742_vm5 }
  0xce   : > { %v737_v28 = vmul.f32 %v1685_v26, %v736_v27 }
  0xd0   : > { %v738_v29 = vmul.f32 0.5, %v737_v28 }
  0xd2   : > { %v739_v30 = vsub.f32 1.5, %v738_v29 }
  0xd4   : > { %v740_v31 = vmul.f32 %v1685_v26, %v739_v30 }
  0xd6   : > { %v744_v34 = vsel %vm743_vm7, %v1685_v26, %v740_v31 }
  0xd7   : > { %v745_v35 = vmul.f32 %v744_v34, %v733_v32 }
  0xd9   : > { %v749_v37 = vmul.f32 %v1674_v33, %v745_v35 }
  0xdb   : > { %v753_v38 = vadd.f32 %v1675_v36, %v749_v37 }
  0xdd   : > { %v754_v39 = vpack.c.bf16 %v753_v38, %v753_v38 }
  0xdf   : > { %1505 = vmatmul.msk.bf16.vlgmr.msra.gmra.mxu0 %vm714_vm3, %v754_v39 }
 0x15c   : > { %v787_v41 = vpop.f32.mrf.mxu0 }
 0x15d   : > { %v788_v42 = vadd.f32 %v1676_v40, %v787_v41 }
 0x15f   : > { %v2072_v43 = vpack.c.bf16 %v788_v42, %v788_v42 }
 0x161   : > { %851 = vrot.lane.b32.xlu0 %v2072_v43, %s1808_s17  ;;  %827 = vrot.lane.b32.xlu2 %v2072_v43, %s1809_s28 }
 0x162   : > { %793 = vrot.lane.b32.xlu1 %v2072_v43, %s1810_s27  ;;  %s2289_s27 = sld [smem:[#allocation22_spill]] }
 0x164   : > { %v789_v44 = vpop.f32.mrf.mxu0 }
 0x169   : > { %963 = vrot.lane.b32.xlu0 %v2072_v43, %s1811_s30  ;;  %s2290_s30 = scalar_lea.vmem %s2289_s27, %s1978_s16 }
 0x171   : > { %907 = vrot.lane.b32.xlu0 %v2072_v43, %s1812_s25 }
 0x1bb   : > { %v828_v45 = vpop.permute.xlu2 %827 }
 0x1bc   : > { %v834_v46 = vsel %vm832_vm8, %v828_v45, 0 }
 0x1bd   : > { %843 = vmatpush.bf16.msra.mxu2 %v834_v46 }
 0x1d3   : > { %v852_v47 = vpop.permute.xlu0 %851 }
 0x1d4   : > { %v794_v48 = vpop.permute.xlu1 %793  ;;  %v857_v49 = vsel %vm795_vm9, %v852_v47, 0 }
 0x1d5   : > { %v800_v50 = vsel %vm795_vm9, %v794_v48, 0  ;;  %866 = vmatpush.bf16.xpose.msrb.mxu2 %v857_v49 }
 0x1d6   : > { %809 = vmatpush.bf16.xpose.msra.mxu1 %v800_v50 }
 0x1db   : > { %v964_v51 = vpop.permute.xlu0 %963 }
 0x1dc   : > { %v969_v52 = vsel %vm795_vm9, %v964_v51, 0 }
 0x1dd   : > { %1506 = vmatmul.msk.bf16.vlgmr.msra.gmra.mxu1 %vm795_vm9, %v2072_v43  ;;  %978 = vmatpush.bf16.xpose.msra.mxu3 %v969_v52 }
 0x1e3   : > { %v908_v53 = vpop.permute.xlu0 %907 }
 0x1e4   : > { %v913_v54 = vsel %vm795_vm9, %v908_v53, 0 }
 0x1e5   : > { %922 = vmatpush.bf16.xpose.msrb.mxu0 %v913_v54 }
 0x25a   : > { %v811_v56 = vpop.f32.mrf.mxu1 }
 0x25b   : > { %v812_v57 = vadd.f32 %v811_v56, %v711_v55 }
 0x25d   : > { %v815_v58 = vsel %vm795_vm9, %v812_v57, -inf }
 0x25e   : > { %816 = vmax.xlane.f32.xlu1 %v815_v58 }
 0x262   : > { %v813_v59 = vpop.f32.mrf.mxu1 }
 0x2d1   : > { %v817_v60 = vpop.xlane.xlu1 %816 }
 0x2d2   : > { %v818_v61 = vsub.f32 %v812_v57, %v817_v60 }
 0x2d4   : > { %v819_v62 = vmul.f32 1.442695, %v818_v61 }
 0x2d6   : > { %1686 = vpow2.f32 %v819_v62 }
 0x2dc   : > { %v1687_v63 = vpop.eup %1686 }
 0x2dd   : > { %v821_v0 = vsel %vm795_vm9, %v1687_v63, 0.0 }
 0x2de   : > { %822 = vadd.xlane.f32.xlu2 %v821_v0  ;;  %v1575_v0 = vld [vmem:[%s2004_s26] sm:$0xff] }
 0x2f6   : > { %849 = vrot.lane.b32.xlu2 %v2072_v43, %s1813_s22 }
 0x2fe   : > { %961 = vrot.lane.b32.xlu2 %v2072_v43, %s1814_s3 }
 0x306   : > { %905 = vrot.lane.b32.xlu2 %v2072_v43, %s1815_s5 }
 0x351   : > { %v823_v1 = vpop.xlane.xlu2 %822 }
 0x352   : > { %1688 = vrcp.f32 %v823_v1 }
 0x358   : > { %v1689_v2 = vpop.eup %1688 }
 0x359   : > { %v850_v3 = vpop.permute.xlu2 %849  ;;  %v825_v4 = vmul.f32 %v1689_v2, %v1687_v63  ;;  %v1576_v63 = vld [vmem:[%s2004_s26 + $0x8] sm:$0xff]  ;;  %s2288_s26 = scalar_lea.vmem %s2231_s6, %s1978_s16 }
 0x35a   : > { %1064 = vmatpush.bf16.msra.mxu0 %v1576_v63 }
 0x35b   : > { %v826_v5 = vpack.c.bf16 %v825_v4, %v825_v4 }
 0x35d   : > { %1507 = vmatmul.msk.bf16.vlgmr.msra.gmra.mxu2 %vm795_vm9, %v826_v5 }
 0x35e   : > { %1065 = vmatpush.bf16.msra.mxu0 %v1575_v0 }
 0x361   : > { %v962_v7 = vpop.permute.xlu2 %961 }
 0x362   : > { %1512 = vmatmul.msk.bf16.vlgmr.msra.gmra.mxu3 %vm795_vm9, %v962_v7 }
 0x369   : > { %v906_v8 = vpop.permute.xlu2 %905 }
 0x36a   : > { %1510 = vmatmul.msk.bf16.vlgmr.msrb.gmra.mxu0 %vm795_vm9, %v906_v8 }
 0x36d   : > { %1508 = vmatmul.msk.bf16.vlgmr.msrb.gmra.mxu2 %vm795_vm9, %v850_v3 }
 0x3e0   : > { %v2095_v9 = vpop.f32.mrf.mxu2 }
 0x3e5   : > { %v980_v10 = vpop.f32.mrf.mxu3 }
 0x3e6   : > { %v981_v11 = vadd.f32 %v980_v10, %v711_v55  ;;  %v1677_v10 = vld [vmem:[%s2288_s26] ss:$0 sm:$0xff] }
 0x3e7   : > { %v924_v12 = vpop.f32.mrf.mxu0 }
 0x3e8   : > { %v925_v13 = vadd.f32 %v924_v12, %v711_v55  ;;  %v847_v14 = vpop.f32.mrf.mxu2  ;;  %v984_v15 = vsel %vm795_vm9, %v981_v11, -inf }
 0x3e9   : > { %985 = vmax.xlane.f32.xlu0 %v984_v15 }
 0x3ea   : > { %v928_v16 = vsel %vm795_vm9, %v925_v13, -inf }
 0x3eb   : > { %929 = vmax.xlane.f32.xlu2 %v928_v16 }
 0x3ed   : > { %v982_v17 = vpop.f32.mrf.mxu3 }
 0x3ee   : > { %v1578_v17 = vld [vmem:[%s2021_s18 + $0x8] sm:$0xff] }
 0x3ef   : > { %v926_v18 = vpop.f32.mrf.mxu0 }
 0x3f0   : > { %v868_v20 = vpop.f32.mrf.mxu2  ;;  %v1577_v18 = vld [vmem:[%s2021_s18] sm:$0xff] }
 0x3f1   : > { %v869_v21 = vadd.f32 %v868_v20, %v711_v55 }
 0x3f3   : > { %v872_v22 = vsel %vm795_vm9, %v869_v21, -inf }
 0x3f4   : > { %873 = vmax.xlane.f32.xlu1 %v872_v22 }
 0x3f8   : > { %v870_v23 = vpop.f32.mrf.mxu2 }
 0x403   : > { %996 = vrot.lane.b32.xlu2 %v2072_v43, %s1816_s13 }
 0x45c   : > { %v986_v34 = vpop.xlane.xlu0 %985 }
 0x45d   : > { %v987_v35 = vsub.f32 %v981_v11, %v986_v34 }
 0x45e   : > { %v930_v24 = vpop.xlane.xlu2 %929 }
 0x45f   : > { %v931_v25 = vsub.f32 %v925_v13, %v930_v24  ;;  %v988_v36 = vmul.f32 1.442695, %v987_v35  ;;  %v1586_v24 = vld [vmem:[%s2035_s7 + $0x38] sm:$0xff]  ;;  %v1678_v35 = vld [vmem:[%s2290_s30] ss:$0 sm:$0xff] }
 0x460   : > { %1221 = vmatpush.bf16.msrb.mxu3 %v1586_v24 }
 0x461   : > { %v932_v26 = vmul.f32 1.442695, %v931_v25 }
 0x463   : > { %1690 = vpow2.f32 %v932_v26  ;;  %v1585_v26 = vld [vmem:[%s2035_s7 + $0x30] sm:$0xff] }
 0x464   : > { %1222 = vmatpush.bf16.msrb.mxu3 %v1585_v26 }
 0x466   : > { %v997_v47 = vpop.permute.xlu2 %996 }
 0x467   : > { %v874_v27 = vpop.xlane.xlu1 %873  ;;  %v1002_v51 = vsel %vm832_vm8, %v997_v47, 0  ;;  %v1579_v47 = vld [vmem:[%s2035_s7] sm:$0xff] }
 0x468   : > { %v875_v28 = vsub.f32 %v869_v21, %v874_v27 }
 0x469   : > { %v1691_v29 = vpop.eup %1690 }
 0x46a   : > { %v876_v30 = vmul.f32 1.442695, %v875_v28  ;;  %v934_v31 = vsel %vm795_vm9, %v1691_v29, 0.0 }
 0x46b   : > { %935 = vadd.xlane.f32.xlu0 %v934_v31 }
 0x46c   : > { %1692 = vpow2.f32 %v876_v30 }
 0x46d   : > { %1694 = vpow2.f32 %v988_v36 }
 0x472   : > { %v1693_v32 = vpop.eup %1692 }
 0x473   : > { %v878_v33 = vsel %vm795_vm9, %v1693_v32, 0.0  ;;  %v1695_v37 = vpop.eup %1694 }
 0x474   : > { %879 = vadd.xlane.f32.xlu1 %v878_v33  ;;  %v990_v38 = vsel %vm795_vm9, %v1695_v37, 0.0 }
 0x47f   : > { %940 = vrot.lane.b32.xlu0 %v2072_v43, %s1817_s19 }
 0x48d   : > { %884 = vrot.lane.b32.xlu1 %v2072_v43, %s1818_s20 }
 0x4b7   : > { %991 = vadd.xlane.f32.xlu1 %v990_v38  ;;  %v1679_v38 = vld [vmem:[%s677_s0] ss:$0 sm:$0xff] }
 0x4de   : > { %v936_v39 = vpop.xlane.xlu0 %935 }
 0x4df   : > { %1696 = vrcp.f32 %v936_v39 }
 0x4e5   : > { %v1697_v40 = vpop.eup %1696 }
 0x4e6   : > { %v938_v41 = vmul.f32 %v1697_v40, %v1691_v29 }
 0x4e7   : > { %v880_v44 = vpop.xlane.xlu1 %879 }
 0x4e8   : > { %v939_v46 = vpack.c.bf16 %v938_v41, %v938_v41  ;;  %1698 = vrcp.f32 %v880_v44  ;;  %v1583_v44 = vld [vmem:[%s2035_s7 + $0x20] sm:$0xff] }
 0x4ee   : > { %v1699_v43 = vpop.eup %1698 }
 0x4ef   : > { %v882_v48 = vmul.f32 %v1699_v43, %v1693_v32  ;;  %v1580_v43 = vld [vmem:[%s2035_s7 + $0x8] sm:$0xff] }
 0x4f1   : > { %v941_v42 = vpop.permute.xlu0 %940  ;;  %v883_v52 = vpack.c.bf16 %v882_v48, %v882_v48  ;;  %v1680_v48 = vld [vmem:[%s685_s11] ss:$0 sm:$0xff]  ;;  %s2291_s11 = sld [smem:[#allocation9_spill]] }
 0x4f2   : > { %v946_v45 = vsel %vm832_vm8, %v941_v42, 0  ;;  %v1584_v42 = vld [vmem:[%s2035_s7 + $0x28] sm:$0xff] }
 0x4f3   : > { %955 = vmatpush.bf16.msrb.mxu1 %v946_v45  ;;  %1223 = vmatpush.bf16.msrb.mxu3 %v1584_v42  ;;  %v1582_v45 = vld [vmem:[%s2035_s7 + $0x18] sm:$0xff] }
 0x4f6   : > { %1511 = vmatmul.msk.bf16.vlgmr.msrb.gmra.mxu1 %vm795_vm9, %v939_v46  ;;  %v1581_v46 = vld [vmem:[%s2035_s7 + $0x10] sm:$0xff] }
 0x4f7   : > { %1136 = vmatpush.bf16.msra.mxu1 %v1578_v17  ;;  %1224 = vmatpush.bf16.msrb.mxu3 %v1583_v44  ;;  %p1564_p1 = scmp.ne.s32.totalorder %s2291_s11, 1 }
 0x4f8   : > { %s2292_s13 = sld [smem:[#allocation24_spill]] (!%p1564_p1) }
 0x4fb   : > { %1137 = vmatpush.bf16.msra.mxu1 %v1577_v18  ;;  %1225 = vmatpush.bf16.msrb.mxu3 %v1582_v45 }
 0x4ff   : > { %v885_v49 = vpop.permute.xlu1 %884  ;;  %1226 = vmatpush.bf16.msrb.mxu3 %v1581_v46 }
 0x500   : > { %v890_v50 = vsel %vm832_vm8, %v885_v49, 0 }
 0x501   : > { %899 = vmatpush.bf16.msra.mxu2 %v890_v50 }
 0x503   : > { %1227 = vmatpush.bf16.msrb.mxu3 %v1580_v43 }
 0x504   : > { %1509 = vmatmul.msk.bf16.vlgmr.msra.gmra.mxu2 %vm795_vm9, %v883_v52 }
 0x505   : > { %1011 = vmatpush.bf16.msrb.mxu2 %v1002_v51 }
 0x507   : > { %1228 = vmatpush.bf16.msrb.mxu3 %v1579_v47 }
 0x52a   : > { %v992_v53 = vpop.xlane.xlu1 %991 }
 0x52b   : > { %1700 = vrcp.f32 %v992_v53 }
 0x531   : > { %v1701_v54 = vpop.eup %1700 }
 0x532   : > { %v994_v55 = vmul.f32 %v1701_v54, %v1695_v37 }
 0x534   : > { %v995_v56 = vpack.c.bf16 %v994_v55, %v994_v55 }
 0x536   : > { %1513 = vmatmul.msk.bf16.vlgmr.msrb.gmra.mxu2 %vm795_vm9, %v995_v56 }
 0x573   : > { %v957_v57 = vpop.f32.mrf.mxu1 }
 0x574   : > { %1022 = vrot.lane.b32.xlu0 %v957_v57, %s1819_s23  ;;  %s2293_s23 = sld [smem:[#allocation25_spill]] (!%p1564_p1) }
 0x57b   : > { %v959_v58 = vpop.f32.mrf.mxu1 }
 0x587   : > { %v901_v59 = vpop.f32.mrf.mxu2 }
 0x588   : > { %1018 = vrot.lane.b32.xlu2 %v901_v59, %s1820_s24 }
 0x58f   : > { %v903_v60 = vpop.f32.mrf.mxu2 }
 0x5b9   : > { %v1013_v61 = vpop.f32.mrf.mxu2 }
 0x5ba   : > { %1026 = vrot.lane.b32.xlu2 %v1013_v61, %s1821_s21 }
 0x5c1   : > { %v1015_v62 = vpop.f32.mrf.mxu2 }
 0x5c2   : > { %v1681_v62 = vld [vmem:[%s693_s15] ss:$0 sm:$0xff] }
 0x5e2   : > { %v1019_v1 = vpop.permute.xlu2 %1018 }
 0x5e3   : > { %v1029_v3 = vsel %vm795_vm9, %v2095_v9, %v1019_v1 }
 0x5e6   : > { %v1023_v2 = vpop.permute.xlu0 %1022 }
 0x5e7   : > { %v1031_v4 = vsel %vm1030_vm10, %v1029_v3, %v1023_v2 }
 0x614   : > { %v1027_v5 = vpop.permute.xlu2 %1026 }
 0x615   : > { %v1033_v7 = vsel %vm1032_vm11, %v1031_v4, %v1027_v5 }
 0x616   : > { %v1034_v8 = vpack.c.bf16 %v1033_v7, %v1033_v7 }
 0x618   : > { %1522 = vmatmul.msk.bf16.vlgmr.msra.gmra.mxu0 %vm714_vm3, %v1034_v8 }
 0x695   : > { %v1067_v11 = vpop.f32.mrf.mxu0 }
 0x696   : > { %v1068_v12 = vadd.f32 %v1677_v10, %v1067_v11 }
 0x698   : > { %v2123_v13 = vadd.f32 %v1068_v12, %v2042_v6 }
 0x69a   : > { %v1074_v9 = vsel %vm714_vm3, %v2123_v13, 0.0  ;;  %v1078_v14 = vmul.f32 %v2123_v13, %v2123_v13 }
 0x69b   : > { %1075 = vadd.xlane.f32.xlu0 %v1074_v9 }
 0x69c   : > { %v1079_v15 = vsel %vm714_vm3, %v1078_v14, 0.0 }
 0x69d   : > { %v1069_v16 = vpop.f32.mrf.mxu0  ;;  %1080 = vadd.xlane.f32.xlu1 %v1079_v15 }
 0x70e   : > { %v1076_v20 = vpop.xlane.xlu0 %1075 }
 0x70f   : > { %v1077_v6 = vmul.f32 %v1076_v20, %v2051_v19 }
 0x710   : > { %v1081_v21 = vpop.xlane.xlu1 %1080 }
 0x711   : > { %v1083_v22 = vmul.f32 %v1077_v6, %v1077_v6  ;;  %v1082_v23 = vmul.f32 %v1081_v21, %v2051_v19  ;;  %v1085_v34 = vsub.f32 %v2123_v13, %v1077_v6 }
 0x713   : > { %v1084_v25 = vsub.f32 %v1082_v23, %v1083_v22 }
 0x715   : > { %v1086_v27 = vadd.f32 1e-05, %v1084_v25 }
 0x717   : > { %1702 = vrsqrt.f32 %v1086_v27  ;;  %vm1093_vm13 = vweird.f32 %v1086_v27 }
 0x71d   : > { %v1703_v28 = vpop.eup %1702 }
 0x71e   : > { %v1088_v29 = vmul.f32 %v1703_v28, %v1086_v27  ;;  %vm1094_vm12 = vweird.f32 %v1703_v28 }
 0x71f   : > { %vm1095_vm14 = vmor %vm1093_vm13, %vm1094_vm12 }
 0x720   : > { %v1089_v30 = vmul.f32 %v1703_v28, %v1088_v29 }
 0x722   : > { %v1090_v31 = vmul.f32 0.5, %v1089_v30 }
 0x724   : > { %v1091_v32 = vsub.f32 1.5, %v1090_v31 }
 0x726   : > { %v1092_v33 = vmul.f32 %v1703_v28, %v1091_v32 }
 0x728   : > { %v1096_v36 = vsel %vm1095_vm14, %v1703_v28, %v1092_v33 }
 0x729   : > { %v1097_v37 = vmul.f32 %v1096_v36, %v1085_v34 }
 0x72b   : > { %v1101_v39 = vmul.f32 %v1678_v35, %v1097_v37 }
 0x72d   : > { %v1105_v40 = vadd.f32 %v1679_v38, %v1101_v39 }
 0x72f   : > { %v1106_v41 = vpack.c.bf16 %v1105_v40, %v1105_v40 }
 0x731   : > { %1531 = vmatmul.msk.bf16.vlgmr.msra.gmra.mxu1 %vm714_vm3, %v1106_v41 }
 0x7ae   : > { %v1139_v49 = vpop.f32.mrf.mxu1 }
 0x7af   : > { %v1140_v50 = vadd.f32 %v1680_v48, %v1139_v49 }
 0x7b1   : > { %v1144_v51 = vmul.f32 0.044715, %v1140_v50  ;;  %v1143_v58 = vmul.f32 0.5, %v1140_v50 }
 0x7b3   : > { %v1145_v52 = vmul.f32 %v1144_v51, %v1140_v50 }
 0x7b5   : > { %v1146_v53 = vmul.f32 %v1145_v52, %v1140_v50 }
 0x7b6   : > { %v1141_v54 = vpop.f32.mrf.mxu1 }
 0x7b7   : > { %v1147_v55 = vadd.f32 %v1146_v53, %v1140_v50 }
 0x7b9   : > { %v1148_v56 = vmul.f32 0.7978846, %v1147_v55 }
 0x7bb   : > { %1704 = vtanh.f32 %v1148_v56 }
 0x7c1   : > { %v1705_v57 = vpop.eup %1704 }
 0x7c2   : > { %v1150_v59 = vadd.f32 1.0, %v1705_v57 }
 0x7c4   : > { %v1151_v60 = vmul.f32 %v1150_v59, %v1143_v58 }
 0x7c6   : > { %v1152_v61 = vpack.c.bf16 %v1151_v60, %v1151_v60 }
 0x7c8   : > { %1229 = vmatmul.bf16.vlgmr.msrb.gmra.mxu3 %v1152_v61 }
 0x84b   : > { %v1230_v63 = vpop.f32.mrf.mxu3 }
 0x84c   : > { %v1231_v0 = vadd.f32 %v1681_v62, %v1230_v63 }
 0x84e   : > { %v1234_v1 = vadd.f32 %v1231_v0, %v2123_v13 }
 0x84f   : > { %1239 = sbr.rel (%p1564_p1) target bundleno = 2288 (0x8f0), region = 88 }
 0x850   : > { %1235 = vst.msk [vmem:[%s2037_s14] sm:$0xff] %vm714_vm3, %v1234_v1 }
 0x853   : > { %v1232_v2 = vpop.f32.mrf.mxu3 }
 0x854   : > { %v1242_v3 = vsel %vm714_vm3, %v1234_v1, 0.0  ;;  %v1246_v4 = vmul.f32 %v1234_v1, %v1234_v1  ;;  %v1706_v21 = vld [vmem:[%s2292_s13] ss:$0 sm:$0xff] }
 0x855   : > { %1243 = vadd.xlane.f32.xlu0 %v1242_v3  ;;  %v1707_v23 = vld [vmem:[%s2293_s23] ss:$0 sm:$0xff] }
 0x856   : > { %v1247_v5 = vsel %vm714_vm3, %v1246_v4, 0.0 }
 0x85d   : > { %1248 = vadd.xlane.f32.xlu0 %v1247_v5 }
 0x8c8   : > { %v1244_v7 = vpop.xlane.xlu0 %1243 }
 0x8c9   : > { %v1245_v8 = vmul.f32 %v1244_v7, %v2051_v19 }
 0x8cb   : > { %v1251_v11 = vmul.f32 %v1245_v8, %v1245_v8  ;;  %v1253_v6 = vsub.f32 %v1234_v1, %v1245_v8 }
 0x8d0   : > { %v1249_v10 = vpop.xlane.xlu0 %1248 }
 0x8d1   : > { %v1250_v12 = vmul.f32 %v1249_v10, %v2051_v19 }
 0x8d3   : > { %v1252_v13 = vsub.f32 %v1250_v12, %v1251_v11 }
 0x8d5   : > { %v1254_v9 = vadd.f32 1e-05, %v1252_v13 }
 0x8d7   : > { %1708 = vrsqrt.f32 %v1254_v9  ;;  %vm1261_vm0 = vweird.f32 %v1254_v9 }
 0x8dd   : > { %v1709_v14 = vpop.eup %1708 }
 0x8de   : > { %v1256_v15 = vmul.f32 %v1709_v14, %v1254_v9  ;;  %vm1262_vm15 = vweird.f32 %v1709_v14 }
 0x8df   : > { %vm1263_vm1 = vmor %vm1261_vm0, %vm1262_vm15 }
 0x8e0   : > { %v1257_v16 = vmul.f32 %v1709_v14, %v1256_v15 }
 0x8e2   : > { %v1258_v17 = vmul.f32 0.5, %v1257_v16 }
 0x8e4   : > { %v1259_v18 = vsub.f32 1.5, %v1258_v17 }
 0x8e6   : > { %v1260_v20 = vmul.f32 %v1709_v14, %v1259_v18 }
 0x8e8   : > { %v1264_v22 = vsel %vm1263_vm1, %v1709_v14, %v1260_v20 }
 0x8e9   : > { %v1265_v19 = vmul.f32 %v1264_v22, %v1253_v6 }
 0x8eb   : > { %v1269_v24 = vmul.f32 %v1706_v21, %v1265_v19 }
 0x8ed   : > { %v1273_v25 = vadd.f32 %v1707_v23, %v1269_v24 }
 0x8ef   : > { %1274 = vst.msk [vmem:[%s2037_s14] sm:$0xff] %vm714_vm3, %v1273_v25 }
 0x8f0 PF: > { %s2294_s24 = sld [smem:[#allocation10_spill]]  ;;  %s1288_s30 = sshll.u32 %s2037_s14, 4  ;;  %s1289_s30 = int_to_ptr.vmem [resolvable:$true] %s1288_s30 }
 0x8f1   : > { %s2295_s21 = sld [smem:[#allocation7_spill]] }
 0x8f2   : > { %s2297_s28 = sld [smem:[#allocation26_spill]] }
 0x8f6   : > { %s1566_s17 = sshll.u32 %s2294_s24, 3 }
 0x8f7   : > { %s2298_s22 = sand.u32 1, %s2295_s21  }
 0x8f8   : > { %s1286_s27 = scalar_lea.hbm %s2297_s28, %s1566_s17  ;;  %s1276_s3 = scalar_lea.sflag [#allocation4], %s2298_s22 }
 0x8f9   : > { %s1290_s25 = sshll.u32 %s1286_s27, 4  ;;  %s1730_s16 = scalar_lea.hbm %s2297_s28, 16  ;;  %s1291_s25 = int_to_ptr.hbm [resolvable:$true] %s1290_s25 }
 0x8fa   : > { %s1724_s0 = sshra.s32 %s1291_s25, 4  ;;  %s1725_s0 = int_to_ptr.hbm [resolvable:$true] %s1724_s0 }
 0x8fb   : > { %s1726_s7 = scalar_lea.hbm %s1725_s0, 8  ;;  %p1731_p6 = scmp.lt.s32.totalorder %s1725_s0, %s2297_s28 }
 0x8fc   : > { %p1727_p2 = scmp.ne.s32.totalorder %s1725_s0, %s1726_s7  ;;  %p1732_p7 = scmp.lt.s32.totalorder %s1730_s16, %s1726_s7 }
 0x8fe   : > { %p1728_p4 = pnand %p1727_p2, %p1951_p3  ;;  %p1733_p8 = por %p1732_p7, %p1731_p6 }
 0x900   : > { %p1729_p5 = pneg %p1728_p4 }
 0x902   : > { %p1734_p10 = pnand %p1733_p8, %p1729_p5 }
 0x904   : > { %1737 = shalt.err (!%p1734_p10)
}
 0x905   : > { %1587 = dma.vmem_to_hbm [thread:$0]  (%p1951_p3), %s1289_s30, 128, %s1291_s25, %s1276_s3  }
 0x906 PF: > { %s2299_s14 = sld [smem:[#allocation13_spill]] }
 0x907   : > { %s2300_s19 = sld [smem:[#allocation6_spill]] }
 0x90c   : > { %p1593_p11 = scmp.ge.s32.totalorder %s2299_s14, 2 }
 0x90d   : > { %s1302_s23 = sand.u32 1, %s2300_s19  }
 0x90e   : > { %p1590_p12 = pnand %p1593_p11, %p1961_p9  ;;  %s1303_s24 = scalar_lea.sflag [#allocation4], %s1302_s23 }
 0x910   : > { %p1591_p13 = pneg %p1590_p12 }
 0x912   : > { %1771 = dma.done.wait (%p1591_p13), %s1303_s24, 128  }
 0x913   : > { %1773 = vsyncadd (%p1591_p13), %s1303_s24, 4294967168  ;;  %s28_s25 = sadd.s32 1, %s2299_s14   ;;  %s2302_s18 = sld [smem:[#allocation7_spill]] }
 0x914   : > { %p25_p0 = scmp.ge.s32.totalorder %s28_s25, 6   ;;  %s2303_s19 = sld [smem:[#allocation8_spill]] }
 0x915   : > { %s2304_s20 = sld [smem:[#allocation18_spill]] }
 0x916   : > { %s2305_s21 = sld [smem:[#allocation11_spill]]  ;;  %27 = sbr.rel (!%p25_p0) target bundleno = 14 (0xe), region = 159 }
 0x917   : > { %s2306_s22 = sld [smem:[#allocation12_spill]] }
 0x918   : > { %s2307_s23 = sld [smem:[#allocation14_spill]] }
 0x919   : > { %s2308_s24 = sld [smem:[#allocation16_spill]] }
 0x91b   :  { %1309 = vsyncpa [#allocation4], 1 }
 0x91c   :  { %1311 = vsyncpa [#allocation4 + $0x1], 1 }

</bundles_post_ra>
